<compile_context>
chip_gen: v7x
topology: tpu7x:2x2x1
jax: 0.10.0
libtpu: 0.0.40
codegen_flags: <defaults>
</compile_context>

<pallas_src>
import jax
import jax.numpy as jnp
from jax.experimental import pallas as pl
from jax.experimental.pallas import tpu as pltpu

LANE = 128


def _round_up(v, m):
    return -(-v // m) * m


def masked_conv_kernel(x_ref, m_ref, prev_ref, w0_ref, w1_ref, b_ref, y_ref, yf_ref):
    """One (batch, time-tile) program: causal conv1d(k=2) + masked max-pool(k=2).

    x_ref    : (TT, Cin)         input frames of this time tile (compute dtype)
    m_ref    : (TT, 1)           validity mask (1 = valid, 0 = padded), f32
    prev_ref : (1, Cin)          last input frame of the previous time tile
                                 (zeros for the first tile); precomputed in the
                                 wrapper so time tiles are fully independent.
    w0_ref   : (Cin, Cout_pad)   == W[:, :, 0].T  (tap on x[t-1]), lane-padded
    w1_ref   : (Cin, Cout_pad)   == W[:, :, 1].T  (tap on x[t]),   lane-padded
    b_ref    : (1, Cout_pad)     bias (f32), lane-padded
    y_ref    : (TT//2, Cout_pad) pooled output tile (lane-dense)
    yf_ref   : (TT, Cout_pad)    f32 scratch holding the full-tile conv result
    """
    TT = x_ref.shape[0]
    TH = TT // 2

    x_cur = x_ref[...]                                   # (TT, Cin)
    # x[t-1]: roll down one frame; frame 0 comes from the previous tile's last
    # input row (wrapper-precomputed, zeros for the first tile).  Stays in the
    # compute dtype so bf16 inputs keep the bf16 MXU path.
    x_prev = pltpu.roll(x_cur, 1, 0)
    row0 = jax.lax.broadcasted_iota(jnp.int32, x_prev.shape, 0) == 0
    x_prev = jnp.where(row0, prev_ref[...], x_prev)

    # Causal conv1d (kernel=2) on the WHOLE tile: two MXU dots with M=TT and
    # f32 accumulation (bias added once, after pooling).
    yf_ref[...] = (jnp.dot(x_prev, w0_ref[...], preferred_element_type=jnp.float32)
                   + jnp.dot(x_cur, w1_ref[...], preferred_element_type=jnp.float32))

    # Mask-aware max pool over frame pairs (2t, 2t+1): masked frames excluded;
    # a fully masked window falls back to the plain window max — exactly what
    # the reference's "-10*maxval then +10*maxval" trick produces.
    y_e = yf_ref[pl.ds(0, TH, stride=2), :]
    y_o = yf_ref[pl.ds(1, TH, stride=2), :]
    m_e = m_ref[pl.ds(0, TH, stride=2), :]
    m_o = m_ref[pl.ds(1, TH, stride=2), :]

    neg = jnp.float32(-jnp.inf)
    pooled_valid = jnp.maximum(jnp.where(m_e > 0, y_e, neg),
                               jnp.where(m_o > 0, y_o, neg))
    pooled_plain = jnp.maximum(y_e, y_o)
    out = jnp.where((m_e + m_o) > 0, pooled_valid, pooled_plain) + b_ref[...]
    y_ref[...] = out.astype(y_ref.dtype)


def _vmem_estimate(tt, Cin, Cout_pad, in_bytes, out_bytes):
    """Rough double-buffered VMEM footprint (lane-padded) for one program."""
    cin_l = _round_up(Cin, LANE)
    x_buf = 2 * tt * cin_l * in_bytes
    m_buf = 2 * tt * LANE * 4
    prev_buf = 2 * 8 * cin_l * in_bytes
    w_buf = 2 * 2 * _round_up(Cin, 8) * Cout_pad * in_bytes
    b_buf = 2 * 8 * Cout_pad * 4
    o_buf = 2 * (tt // 2) * Cout_pad * out_bytes
    scratch = tt * Cout_pad * 4
    return x_buf + m_buf + prev_buf + w_buf + b_buf + o_buf + scratch


def _pick_time_tile(T, Cin, Cout_pad, in_bytes, out_bytes, budget_bytes):
    """Largest 16-multiple tile fitting the VMEM budget (never far beyond T)."""
    best = 16
    for cand in (16, 32, 64, 128, 256, 512, 1024, 2048):
        if cand > _round_up(T, 16):
            break
        if _vmem_estimate(cand, Cin, Cout_pad, in_bytes, out_bytes) <= budget_bytes:
            best = cand
    return best


def masked_conv_forward(x, mask, weight, bias, pool_size=2, time_tile=None,
                        compute_dtype=None, out_dtype=None,
                        vmem_budget_bytes=32 << 20):
    """Equivalent of Masked_conv(in_chan, out_chan).forward(x, mask).

    x: (B, T, Cin), mask: (B, T, 1), weight: (Cout, Cin, 2), bias: (Cout,)
    returns (y, mask_out): y (B, T//2, Cout), mask_out (B, T//2, 1)

    Pass compute_dtype=jnp.bfloat16 for production sizes (f32 accumulation stays
    inside the kernel) to halve HBM traffic on this memory-bound op.
    """
    assert pool_size == 2, "kernel written for the module's default pool_size=2"
    B, T, Cin = x.shape
    Cout = weight.shape[0]
    assert T % 2 == 0, "even sequence length expected"
    # TODO(synk): odd-T mask tail repeat from the PyTorch module not needed for even T.
    T_out = T // 2

    compute_dtype = compute_dtype if compute_dtype is not None else x.dtype
    out_dtype = out_dtype if out_dtype is not None else x.dtype
    in_bytes = jnp.dtype(compute_dtype).itemsize
    out_bytes = jnp.dtype(out_dtype).itemsize

    # Lane-dense output: pad Cout to a multiple of 128 via zero-padded
    # weights/bias; the pad columns are sliced off after the call.
    Cout_pad = _round_up(Cout, LANE)

    if time_tile is None:
        time_tile = _pick_time_tile(T, Cin, Cout_pad, in_bytes, out_bytes,
                                    vmem_budget_bytes)
    assert time_tile % 16 == 0 and time_tile >= 16

    # Pad T to a multiple of the tile (pad frames are masked out; their pooled
    # outputs land beyond T_out and are sliced away).
    T_pad = _round_up(T, time_tile)
    n_t = T_pad // time_tile
    t_half = time_tile // 2

    x_c = x.astype(compute_dtype)
    mask_f = mask.astype(jnp.float32)
    if T_pad != T:
        x_c = jnp.pad(x_c, ((0, 0), (0, T_pad - T), (0, 0)))
        mask_f = jnp.pad(mask_f, ((0, 0), (0, T_pad - T), (0, 0)))

    # Previous-tile last input row per (batch, tile): removes the serial halo
    # carry so both grid axes can be "parallel" (v7x dual-TensorCore sharding).
    prev = jnp.concatenate(
        [jnp.zeros((B, 1, Cin), compute_dtype),
         x_c[:, time_tile - 1:T_pad - 1:time_tile, :]], axis=1)      # (B, n_t, Cin)
    prev = prev.reshape(B, n_t, 1, Cin)

    w0 = jnp.pad(jnp.transpose(weight[:, :, 0]).astype(compute_dtype),
                 ((0, 0), (0, Cout_pad - Cout)))                      # (Cin, Cout_pad)
    w1 = jnp.pad(jnp.transpose(weight[:, :, 1]).astype(compute_dtype),
                 ((0, 0), (0, Cout_pad - Cout)))
    b2 = jnp.pad(bias.astype(jnp.float32), (0, Cout_pad - Cout)).reshape(1, Cout_pad)

    est = _vmem_estimate(time_tile, Cin, Cout_pad, in_bytes, out_bytes)
    vmem_limit = int(min(max(int(est * 1.5) + (1 << 20), 16 << 20), 48 << 20))

    y = pl.pallas_call(
        masked_conv_kernel,
        out_shape=jax.ShapeDtypeStruct((B, T_pad // 2, Cout_pad), out_dtype),
        grid_spec=pltpu.PrefetchScalarGridSpec(
            num_scalar_prefetch=0,
            grid=(B, n_t),
            in_specs=[
                pl.BlockSpec((None, time_tile, Cin), lambda b, i: (b, i, 0)),
                pl.BlockSpec((None, time_tile, 1), lambda b, i: (b, i, 0)),
                pl.BlockSpec((None, None, 1, Cin), lambda b, i: (b, i, 0, 0)),
                pl.BlockSpec((Cin, Cout_pad), lambda b, i: (0, 0)),
                pl.BlockSpec((Cin, Cout_pad), lambda b, i: (0, 0)),
                pl.BlockSpec((1, Cout_pad), lambda b, i: (0, 0)),
            ],
            out_specs=pl.BlockSpec((None, t_half, Cout_pad), lambda b, i: (b, i, 0)),
            scratch_shapes=[pltpu.VMEM((time_tile, Cout_pad), jnp.float32)],
        ),
        compiler_params=pltpu.CompilerParams(
            dimension_semantics=("parallel", "parallel"),
            vmem_limit_bytes=vmem_limit),
    )(x_c, mask_f, prev, w0, w1, b2)

    y = y[:, :T_out, :Cout]
    # Mask downsample is pure index selection (glue), matching
    # rearrange(mask, 'b (t t2) -> b t t2', t2=2)[:, :, 0][:, :T_out].
    mask_out = mask[:, 0:2 * T_out:2, :]
    return y, mask_out


def _reference(x, mask, weight, bias):
    """Pure-JAX mirror of the PyTorch forward (masked=True, max pool, pool_size=2)."""
    B, T, Cin = x.shape
    xcat = jnp.concatenate([jnp.zeros((B, 1, Cin), x.dtype), x], axis=1)
    y = (jnp.einsum('btc,oc->bto', xcat[:, :T, :], weight[:, :, 0])
         + jnp.einsum('btc,oc->bto', xcat[:, 1:T + 1, :], weight[:, :, 1])
         + bias)
    m = mask[..., 0].astype(jnp.float32)
    maxval = jnp.max(jnp.abs(y))
    y = y - (1.0 - m[:, :, None]) * 10.0 * maxval
    T_out = T // 2
    yp = jnp.max(y[:, :2 * T_out, :].reshape(B, T_out, 2, -1), axis=2)
    yp = yp + (yp < -5.0 * maxval).astype(jnp.float32) * 10.0 * maxval
    mo = mask[:, 0:2 * T_out:2, :]
    return yp, mo


if __name__ == "__main__":
    B, T, C_in, C_out = 2, 32, 4, 8

    key = jax.random.PRNGKey(0)
    kx, kw, kb = jax.random.split(key, 3)
    x = jax.random.normal(kx, (B, T, C_in), dtype=jnp.float32)

    # deterministic nn.Conv1d parameters: weight (out_chan, in_chan, 2), bias (out_chan,)
    weight = 0.3 * jax.random.normal(kw, (C_out, C_in, 2), dtype=jnp.float32)
    bias = 0.1 * jax.random.normal(kb, (C_out,), dtype=jnp.float32)

    # mask: batch 0 fully valid, batch 1 has the last 5 frames padded out
    # (exercises both-valid, half-masked and fully-masked pooling windows)
    valid = jnp.array([T, T - 5])
    mask = (jnp.arange(T)[None, :] < valid[:, None]).astype(jnp.float32)[..., None]

    # 1) f32 path, explicit 16-frame tiles -> two time tiles per batch:
    #    exercises the cross-tile previous-row input and the (B, n_t) parallel grid.
    y, mask_out = masked_conv_forward(x, mask, weight, bias, time_tile=16)
    y = jax.block_until_ready(y)
    mask_out = jax.block_until_ready(mask_out)

    y_ref, mask_ref = _reference(x, mask, weight, bias)
    assert y.shape == (B, T // 2, C_out) and mask_out.shape == (B, T // 2, 1)
    assert jnp.allclose(y, y_ref, atol=1e-3, rtol=1e-3), "f32 mismatch vs reference"
    assert jnp.array_equal(mask_out, mask_ref)

    # 2) bf16 compute path + auto tile selection + awkward T (24 -> padded to 32):
    #    exercises the in-wrapper padding and the reduced-HBM-traffic path.
    T2 = 24
    x2, mask2 = x[:, :T2, :], mask[:, :T2, :]
    y2, mask_out2 = masked_conv_forward(x2, mask2, weight, bias,
                                        compute_dtype=jnp.bfloat16)
    y2 = jax.block_until_ready(y2)
    y2_ref, mask2_ref = _reference(x2, mask2, weight, bias)
    assert y2.shape == (B, T2 // 2, C_out)
    assert jnp.allclose(y2, y2_ref, atol=5e-2, rtol=5e-2), "bf16 mismatch vs reference"
    assert jnp.array_equal(mask_out2, mask2_ref)

    print("KERNEL_OK")
</pallas_src>

<mosaic_0001>
module attributes {stable_mosaic.version = 11 : i64} {
  func.func @masked_conv_kernel(%arg0: i32, %arg1: i32, %arg2: memref<1x16x4xf32, #tpu.memory_space<vmem>>, %arg3: memref<1x16x1xf32, #tpu.memory_space<vmem>>, %arg4: memref<1x1x1x4xf32, #tpu.memory_space<vmem>>, %arg5: memref<4x128xf32, #tpu.memory_space<vmem>>, %arg6: memref<4x128xf32, #tpu.memory_space<vmem>>, %arg7: memref<1x128xf32, #tpu.memory_space<vmem>>, %arg8: memref<1x8x128xf32, #tpu.memory_space<vmem>>, %arg9: memref<16x128xf32, #tpu.memory_space<vmem>>) attributes {dimension_semantics = [#tpu.dimension_semantics<parallel>, #tpu.dimension_semantics<parallel>], iteration_bounds = array<i64: 2, 2>, scalar_prefetch = 0 : i64, scratch_operands = 1 : i64, tpu.core_type = #tpu.core_type<tc>, window_params = [{transform_indices = @transform_0, window_bounds = array<i64: 1, 16, 4>}, {transform_indices = @transform_1, window_bounds = array<i64: 1, 16, 1>}, {transform_indices = @transform_2, window_bounds = array<i64: 1, 1, 1, 4>}, {pipeline_mode = #tpu.pipeline_mode<synchronous>, transform_indices = @transform_3, window_bounds = array<i64: 4, 128>}, {pipeline_mode = #tpu.pipeline_mode<synchronous>, transform_indices = @transform_4, window_bounds = array<i64: 4, 128>}, {pipeline_mode = #tpu.pipeline_mode<synchronous>, transform_indices = @transform_5, window_bounds = array<i64: 1, 128>}, {transform_indices = @transform_6, window_bounds = array<i64: 1, 8, 128>}]} {
    %c0 = arith.constant 0 : index
    %c0_0 = arith.constant 0 : index
    %c0_1 = arith.constant 0 : index
    %0 = vector.load %arg2[%c0, %c0_0, %c0_1] : memref<1x16x4xf32, #tpu.memory_space<vmem>>, vector<1x16x4xf32>
    %1 = vector.shape_cast %0 : vector<1x16x4xf32> to vector<16x4xf32>
    %c1_i32 = arith.constant 1 : i32
    %2 = tpu.dynamic_rotate %1 by %c1_i32 dim 0 : vector<16x4xf32>, i32 -> vector<16x4xf32>
    %3 = tpu.iota {dimensions = array<i32: 0>} : vector<16x4xi32>
    %c0_i32 = arith.constant 0 : i32
    %4 = vector.broadcast %c0_i32 : i32 to vector<16x4xi32>
    %5 = arith.cmpi eq, %3, %4 : vector<16x4xi32>
    %c0_2 = arith.constant 0 : index
    %c0_3 = arith.constant 0 : index
    %c0_4 = arith.constant 0 : index
    %c0_5 = arith.constant 0 : index
    %6 = vector.load %arg4[%c0_2, %c0_3, %c0_4, %c0_5] : memref<1x1x1x4xf32, #tpu.memory_space<vmem>>, vector<1x1x1x4xf32>
    %7 = vector.shape_cast %6 : vector<1x1x1x4xf32> to vector<1x4xf32>
    %8 = vector.shape_cast %7 : vector<1x4xf32> to vector<1x4xf32>
    %9 = vector.broadcast %8 : vector<1x4xf32> to vector<16x4xf32>
    %10 = arith.select %5, %9, %2 : vector<16x4xi1>, vector<16x4xf32>
    %c0_6 = arith.constant 0 : index
    %c0_7 = arith.constant 0 : index
    %11 = vector.load %arg5[%c0_6, %c0_7] : memref<4x128xf32, #tpu.memory_space<vmem>>, vector<4x128xf32>
    %cst = arith.constant dense<0.000000e+00> : vector<16x128xf32>
    %12 = tpu.matmul %10, %11, %cst {dimension_numbers = #tpu.dot_dimension_numbers<[1], [0], [0], [1], [0, 0, 1, 1], [], []>} : vector<16x4xf32>, vector<4x128xf32>, vector<16x128xf32> -> vector<16x128xf32>
    %c0_8 = arith.constant 0 : index
    %c0_9 = arith.constant 0 : index
    %13 = vector.load %arg6[%c0_8, %c0_9] : memref<4x128xf32, #tpu.memory_space<vmem>>, vector<4x128xf32>
    %cst_10 = arith.constant dense<0.000000e+00> : vector<16x128xf32>
    %14 = tpu.matmul %1, %13, %cst_10 {dimension_numbers = #tpu.dot_dimension_numbers<[1], [0], [0], [1], [0, 0, 1, 1], [], []>} : vector<16x4xf32>, vector<4x128xf32>, vector<16x128xf32> -> vector<16x128xf32>
    %15 = arith.addf %12, %14 : vector<16x128xf32>
    %c0_11 = arith.constant 0 : index
    %c0_12 = arith.constant 0 : index
    %16 = vector.load %arg9[%c0_11, %c0_12] : memref<16x128xf32, #tpu.memory_space<vmem>>, vector<16x128xf32>
    tpu.vector_store %arg9[%c0_11, %c0_12], %15 {strides = array<i32>} : memref<16x128xf32, #tpu.memory_space<vmem>>, vector<16x128xf32>,
    %c0_13 = arith.constant 0 : index
    %c0_14 = arith.constant 0 : index
    %17 = tpu.strided_load %arg9[%c0_13, %c0_14] {strides = array<i32: 2, 1>} : memref<16x128xf32, #tpu.memory_space<vmem>>, vector<8x128xf32>
    %c1 = arith.constant 1 : index
    %c0_15 = arith.constant 0 : index
    %18 = tpu.strided_load %arg9[%c1, %c0_15] {strides = array<i32: 2, 1>} : memref<16x128xf32, #tpu.memory_space<vmem>>, vector<8x128xf32>
    %c0_16 = arith.constant 0 : index
    %c0_17 = arith.constant 0 : index
    %c0_18 = arith.constant 0 : index
    %19 = tpu.strided_load %arg3[%c0_16, %c0_17, %c0_18] {strides = array<i32: 1, 2, 1>} : memref<1x16x1xf32, #tpu.memory_space<vmem>>, vector<1x8x1xf32>
    %20 = vector.shape_cast %19 : vector<1x8x1xf32> to vector<8x1xf32>
    %c0_19 = arith.constant 0 : index
    %c1_20 = arith.constant 1 : index
    %c0_21 = arith.constant 0 : index
    %21 = tpu.strided_load %arg3[%c0_19, %c1_20, %c0_21] {strides = array<i32: 1, 2, 1>} : memref<1x16x1xf32, #tpu.memory_space<vmem>>, vector<1x8x1xf32>
    %22 = vector.shape_cast %21 : vector<1x8x1xf32> to vector<8x1xf32>
    %cst_22 = arith.constant 0.000000e+00 : f32
    %23 = vector.broadcast %cst_22 : f32 to vector<8x1xf32>
    %24 = arith.cmpf ogt, %20, %23 : vector<8x1xf32>
    %cst_23 = arith.constant 0xFF800000 : f32
    %25 = vector.shape_cast %24 : vector<8x1xi1> to vector<8x1xi1>
    %26 = vector.broadcast %25 : vector<8x1xi1> to vector<8x128xi1>
    %27 = vector.broadcast %cst_23 : f32 to vector<8x128xf32>
    %28 = arith.select %26, %17, %27 : vector<8x128xi1>, vector<8x128xf32>
    %cst_24 = arith.constant 0.000000e+00 : f32
    %29 = vector.broadcast %cst_24 : f32 to vector<8x1xf32>
    %30 = arith.cmpf ogt, %22, %29 : vector<8x1xf32>
    %cst_25 = arith.constant 0xFF800000 : f32
    %31 = vector.shape_cast %30 : vector<8x1xi1> to vector<8x1xi1>
    %32 = vector.broadcast %31 : vector<8x1xi1> to vector<8x128xi1>
    %33 = vector.broadcast %cst_25 : f32 to vector<8x128xf32>
    %34 = arith.select %32, %18, %33 : vector<8x128xi1>, vector<8x128xf32>
    %35 = arith.maximumf %28, %34 : vector<8x128xf32>
    %36 = arith.maximumf %17, %18 : vector<8x128xf32>
    %37 = arith.addf %20, %22 : vector<8x1xf32>
    %cst_26 = arith.constant 0.000000e+00 : f32
    %38 = vector.broadcast %cst_26 : f32 to vector<8x1xf32>
    %39 = arith.cmpf ogt, %37, %38 : vector<8x1xf32>
    %40 = vector.shape_cast %39 : vector<8x1xi1> to vector<8x1xi1>
    %41 = vector.broadcast %40 : vector<8x1xi1> to vector<8x128xi1>
    %42 = arith.select %41, %35, %36 : vector<8x128xi1>, vector<8x128xf32>
    %c0_27 = arith.constant 0 : index
    %c0_28 = arith.constant 0 : index
    %43 = vector.load %arg7[%c0_27, %c0_28] : memref<1x128xf32, #tpu.memory_space<vmem>>, vector<1x128xf32>
    %44 = vector.broadcast %43 : vector<1x128xf32> to vector<8x128xf32>
    %45 = arith.addf %42, %44 : vector<8x128xf32>
    %c0_29 = arith.constant 0 : index
    %c0_30 = arith.constant 0 : index
    %c0_31 = arith.constant 0 : index
    %46 = vector.load %arg8[%c0_29, %c0_30, %c0_31] : memref<1x8x128xf32, #tpu.memory_space<vmem>>, vector<1x8x128xf32>
    %47 = vector.shape_cast %46 : vector<1x8x128xf32> to vector<8x128xf32>
    %48 = vector.shape_cast %45 : vector<8x128xf32> to vector<1x8x128xf32>
    tpu.vector_store %arg8[%c0_29, %c0_30, %c0_31], %48 {strides = array<i32>} : memref<1x8x128xf32, #tpu.memory_space<vmem>>, vector<1x8x128xf32>,
    return
  }
  func.func @transform_0(%arg0: i32, %arg1: i32) -> (i32, i32, i32) {
    %c0_i32 = arith.constant 0 : i32
    %c0_i32_0 = arith.constant 0 : i32
    return %arg0, %arg1, %c0_i32 : i32, i32, i32
  }
  func.func @transform_1(%arg0: i32, %arg1: i32) -> (i32, i32, i32) {
    %c0_i32 = arith.constant 0 : i32
    %c0_i32_0 = arith.constant 0 : i32
    return %arg0, %arg1, %c0_i32 : i32, i32, i32
  }
  func.func @transform_2(%arg0: i32, %arg1: i32) -> (i32, i32, i32, i32) {
    %c0_i32 = arith.constant 0 : i32
    %c0_i32_0 = arith.constant 0 : i32
    %c0_i32_1 = arith.constant 0 : i32
    return %arg0, %arg1, %c0_i32, %c0_i32_0 : i32, i32, i32, i32
  }
  func.func @transform_3(%arg0: i32, %arg1: i32) -> (i32, i32) {
    %c0_i32 = arith.constant 0 : i32
    %c0_i32_0 = arith.constant 0 : i32
    %c0_i32_1 = arith.constant 0 : i32
    return %c0_i32, %c0_i32_0 : i32, i32
  }
  func.func @transform_4(%arg0: i32, %arg1: i32) -> (i32, i32) {
    %c0_i32 = arith.constant 0 : i32
    %c0_i32_0 = arith.constant 0 : i32
    %c0_i32_1 = arith.constant 0 : i32
    return %c0_i32, %c0_i32_0 : i32, i32
  }
  func.func @transform_5(%arg0: i32, %arg1: i32) -> (i32, i32) {
    %c0_i32 = arith.constant 0 : i32
    %c0_i32_0 = arith.constant 0 : i32
    %c0_i32_1 = arith.constant 0 : i32
    return %c0_i32, %c0_i32_0 : i32, i32
  }
  func.func @transform_6(%arg0: i32, %arg1: i32) -> (i32, i32, i32) {
    %c0_i32 = arith.constant 0 : i32
    %c0_i32_0 = arith.constant 0 : i32
    return %arg0, %arg1, %c0_i32 : i32, i32, i32
  }
}

</mosaic_0001>

<bundles_post_ra>
// kernel: tpu_custom_call.1
= control target key start
LH: loop header
LB: loop body
LE: loop exit
PB: predicated region body
PF: predicated region fallthrough
CT: control target
= control target key end

     0   :  { %s1116_s0 = inlined_call_operand.vmem [shape: f32[2,32,4], index: 0, kind: input, shape index: {}]   ;;  %s1117_s1 = inlined_call_operand.vmem [shape: f32[2,32,1], index: 1, kind: input, shape index: {}]   ;;  %s1118_s2 = inlined_call_operand.vmem [shape: f32[2,2,1,4], index: 2, kind: input, shape index: {}]   ;;  %s1119_s3 = inlined_call_operand.vmem [shape: f32[4,128], index: 3, kind: input, shape index: {}]   ;;  %s1120_s4 = inlined_call_operand.vmem [shape: f32[4,128], index: 4, kind: input, shape index: {}]   ;;  %s1121_s5 = inlined_call_operand.vmem [shape: f32[1,128], index: 5, kind: input, shape index: {}]   ;;  %s1122_s6 = inlined_call_operand.hbm [shape: f32[2,16,128], index: 6, kind: output, shape index: {}]  }
   0x1   :  { %1123 = sst [smem:[#allocation6_spill]] %s1119_s3 }
   0x2   :  { %1124 = sst [smem:[#allocation7_spill]] %s1120_s4 }
   0x3   :  { %11 = vsyncpa [#allocation4], 0 }
   0x4   :  { %13 = vsyncpa [#allocation4 + $0x1], 0  ;;  %s957_s21 = smov 0   ;;  %s959_s22 = smov 0  }
   0x5   :  { %s961_s23 = smov 0   ;;  %s963_s24 = smov 0  }
   0x6   :  { %s965_s25 = smov 0   ;;  %s967_s26 = smov 0  }
   0x7   :  { %s969_s27 = smov 0   ;;  %s971_s28 = smov 0  }
   0x8 LB: > { %s705_s29 = sadd.s32 4294967295, %s918_s28   ;;  %s706_s30 = sadd.s32 4294967294, %s918_s28   ;;  %s918_s28 = sphi %s971_s28, %s19_s28   ;;  %s914_s27 = sphi %s969_s27, %s1135_s27   ;;  %s910_s26 = sphi %s967_s26, %s1134_s26   ;;  %s906_s25 = sphi %s965_s25, %s1133_s25   ;;  %s902_s24 = sphi %s963_s24, %s1132_s24   ;;  %s898_s23 = sphi %s961_s23, %s1131_s23   ;;  %s894_s22 = sphi %s959_s22, %s1130_s22   ;;  %s890_s21 = sphi %s957_s21, %s1129_s21  }
   0x9   : > { %s28_s7 = sadd.s32 1, %s910_s26  ;;  %s31_s8 = sadd.s32 1, %s914_s27 }
   0xa   : > { %p29_p0 = scmp.ge.s32.totalorder %s28_s7, 2  ;;  %p197_p1 = scmp.ne.s32.totalorder %s898_s23, %s894_s22 }
   0xb   : > { %p198_p2 = scmp.eq.s32.totalorder %s705_s29, 3  ;;  %p203_p5 = scmp.ne.s32.totalorder %s894_s22, %s890_s21 }
   0xc   : > { %s1137_s7 = smov (%p29_p0, %s28_s7), 0  ;;  %s1139_s8 = smov (!%p29_p0, %s31_s8), %s914_s27 }
   0xd   : > { %s183_s9 = ssub.s32 %s910_s26, %s1137_s7  ;;  %p1008_p3 = por %p198_p2, %p197_p1 }
   0xe   : > { %p33_p4 = scmp.ge.s32.totalorder %s1139_s8, 2  ;;  %p204_p6 = scmp.eq.s32.totalorder %s706_s30, 3 }
   0xf   : > { %p709_p7 = scmp.ge.s32.totalorder %s918_s28, 1  ;;  %p267_p9 = scmp.lt.s32.totalorder %s918_s28, 5 }
  0x10   : > { %s1141_s8 = smov (%p33_p4, %s1139_s8), 0  ;;  %p1017_p8 = por %p204_p6, %p203_p5 }
  0x11   : > { %s182_s12 = ssub.s32 %s914_s27, %s1141_s8  ;;  %s187_s13 = sadd.s32 1, %s898_s23 }
  0x12   : > { %s184_s14 = sor.u32 %s183_s9, %s182_s12  ;;  %p268_p10 = pnand %p709_p7, %p267_p9 }
  0x13   : > { %p185_p11 = scmp.eq.s32.totalorder %s184_s14, 0  ;;  %s1127_s4 = sld [smem:[#allocation7_spill]] (!%p268_p10)  ;;  %vm374_vm0 = vcmask (!%p268_p10), 1043456   ;;  %v348_v1 = vlaneseq (!%p268_p10)  ;;  %v920_v3 = vmov (!%p268_p10), 0   ;;  %vm367_vm1 = vcmask (!%p268_p10), 31744  }
  0x14   : > { %271 = sbr.rel (%p268_p10) target bundleno = 283 (0x11b), region = 44  ;;  %s711_s18 = sshll.u32 (!%p268_p10), %s902_s24, 1  ;;  %822 = vset.pattern.permute.xlu0 (!%p268_p10), %v920_v3  ;;  %823 = vset.pattern.permute.xlu1 (!%p268_p10), %v920_v3  ;;  %v726_v34 = vld [vmem:[%s1121_s5] ss:$0 sm:$0xff] (!%p268_p10) }
  0x15   : > { %s1026_s15 = scalar_select %p185_p11, %s898_s23, %s187_s13  }
  0x16   : > { %p318_p12 = scmp.lt.s32.totalorder (!%p268_p10), %s906_s25, 1  ;;  %p320_p13 = scmp.lt.s32.totalorder (!%p268_p10), %s711_s18, 3  ;;  %v349_v4 = vshrl.u32 (!%p268_p10), %v348_v1, 7 }
  0x17   : > { %s1128_s3 = sld [smem:[#allocation6_spill]] (!%p268_p10)  ;;  %p339_p0 = scmp.lt.s32.totalorder (!%p268_p10), %s902_s24, 1 }
  0x18   : > { %vm350_vm2 = vcmp.lt.s32.totalorder (!%p268_p10), %v349_v4, 1  ;;  %vm354_vm4 = vcmp.eq.s32.totalorder (!%p268_p10), %v349_v4, 0 }
  0x19   : > { %v366_v0 = vld [vmem:[%s1127_s4] sm:$0xf] (!%p268_p10) }
  0x1a   : > { %738 = vmatprep.subr.msk.mxu1 (!%p268_p10), %vm374_vm0, %v366_v0 }
  0x1b   : > { %739 = vmatpush3.msk.msra.mxu1 %vm374_vm0, %v366_v0  ;;  %s319_s29 = scalar_select %p318_p12, %s906_s25, 1 }
  0x1c   : > { %s1143_s18 = smov (!%p320_p13, %s711_s18), 3 }
  0x1d   : > { %v365_v2 = vld [vmem:[%s1128_s3] sm:$0xf]  ;;  %s712_s30 = sshll.u32 %s319_s29, 2  ;;  %s717_s13 = sshll.u32 %s319_s29, 1 }
  0x1e   : > { %743 = vmatprep.subr.msk.mxu0 %vm374_vm0, %v365_v2  ;;  %s323_s9 = sadd.s32 %s712_s30, %s1143_s18 }
  0x1f   : > { %744 = vmatpush3.msk.msra.mxu0 %vm374_vm0, %v365_v2  ;;  %s713_s12 = sshll.u32 %s323_s9, 3 }
  0x20   : > { %s325_s17 = scalar_lea.vmem %s1116_s0, %s713_s12  ;;  %s335_s3 = scalar_lea.vmem %s1117_s1, %s713_s12 }
  0x21   : > { %v344_v5 = vld [vmem:[%s325_s17] sm:$0xff]  ;;  %v345_v6 = vld [vmem:[%s325_s17 + $0x8] sm:$0xff]  ;;  %s340_s4 = scalar_select %p339_p0, %s902_s24, 1 }
  0x22   : > { %v542_v7 = vld [vmem:[%s335_s3] ss:$2 sm:$0xff]  ;;  %v346_v8 = vrot.slane %v344_v5, 7  ;;  %v347_v9 = vrot.slane %v345_v6, 7  ;;  %740 = vmatprep.mubr.msk.f32.mxu1 %vm367_vm1, %v344_v5  ;;  %v725_v10 = vld [vmem:[%s335_s3 + $0x1] ss:$2 sm:$0xff] }
  0x23   : > { %vm545_vm3 = vcmp.gt.f32.partialorder %v542_v7, 0.0  ;;  %741 = vmatmul.mubr.msk.f32.vlgmr.msra.gmra.mrb[0].mxu1 %vm367_vm1, %v345_v6  ;;  %s342_s18 = sadd.s32 %s717_s13, %s340_s4  ;;  %vm552_vm5 = vcmp.gt.f32.partialorder %v725_v10, 0.0  ;;  %v561_v12 = vadd.f32 %v725_v10, %v542_v7  ;;  %s314_s3 = sand.u32 1, %s894_s22  }
  0x24   : > { %v546_v11 = vsel %vm545_vm3, 1, %v920_v3  ;;  %s343_s9 = scalar_lea.vmem %s1118_s2, %s342_s18  ;;  %v352_v13 = vsel %vm350_vm2, %v347_v9, %v346_v8  ;;  %v351_v15 = vsel %vm350_vm2, %v346_v8, %v347_v9  ;;  %v553_v16 = vsel %vm552_vm5, 1, %v920_v3  ;;  %s710_s4 = sshll.u32 %s314_s3, 3 }
  0x25   : > { %548 = vperm.xlu0 %822, %v546_v11   ;;  %v718_v14 = vld [vmem:[%s343_s9] ss:$0 sm:$0xff]  ;;  %vm562_vm6 = vcmp.gt.f32.partialorder %v561_v12, 0.0  ;;  %s728_s12 = sshll.u32 %s906_s25, 1  ;;  %s316_s19 = scalar_lea.vmem [#allocation3], %s710_s4 }
  0x26   : > { %v363_v17 = vsel %vm354_vm4, %v718_v14, %v352_v13  ;;  %v563_v18 = vsel %vm562_vm6, 1, %v920_v3  ;;  %s590_s13 = sadd.s32 %s902_s24, %s728_s12  ;;  %s594_s25 = sshll.u32 %s316_s19, 4  ;;  %s1065_s25 = int_to_ptr.vmem [resolvable:$true] %s594_s25 }
  0x27   : > { %745 = vmatprep.mubr.msk.f32.mxu0 %vm367_vm1, %v363_v17  ;;  %565 = vperm.xlu1 %823, %v563_v18   ;;  %s729_s17 = sshll.u32 %s590_s13, 7  ;;  %s579_s29 = scalar_lea.sflag [#allocation4], %s314_s3 }
  0x28   : > { %746 = vmatmul.mubr.msk.f32.vlgmr.msra.gmra.mrb[0].mxu0 %vm367_vm1, %v351_v15  ;;  %s1063_s18 = scalar_lea.hbm %s1122_s6, %s729_s17  ;;  %s824_s30 = scalar_lea.vmem %s1065_s25, 128 }
  0x29   : > { %555 = vperm.xlu0 %822, %v553_v16   ;;  %p825_p1 = scmp.ne.s32.totalorder %s1065_s25, %s824_s30  ;;  %s921_s9 = smov [#allocation3]  }
  0x2a   : > { %s828_s4 = sshll.u32 %s921_s9, 4  ;;  %s829_s4 = int_to_ptr.vmem [resolvable:$false] %s828_s4 }
  0x2b   : > { %p826_p2 = pnand %p825_p1, %p1008_p3  ;;  %s830_s12 = scalar_lea.vmem %s829_s4, 256 }
  0x2c   : > { %p831_p5 = scmp.lt.s32.totalorder %s1065_s25, %s829_s4  ;;  %p832_p6 = scmp.lt.s32.totalorder %s830_s12, %s824_s30 }
  0x2d   : > { %p827_p4 = pneg %p826_p2 }
  0x2e   : > { %p833_p7 = por %p832_p6, %p831_p5 }
  0x30   : > { %p834_p9 = pnand %p833_p7, %p827_p4 }
  0xa4   : > { %v549_v25 = vpop.permute.xlu0 %548 }
  0xa5   : > { %vm550_vm7 = vcmp.eq.s32.totalorder %v549_v25, 1 }
  0xa6   : > { %v566_v27 = vpop.permute.xlu1 %565 }
  0xa7   : > { %vm567_vm9 = vcmp.eq.s32.totalorder %v566_v27, 1 }
  0xa8   : > { %v556_v26 = vpop.permute.xlu0 %555 }
  0xa9   : > { %vm557_vm8 = vcmp.eq.s32.totalorder %v556_v26, 1 }
  0xf6   : > { %v742_v19 = vpop.f32.mrb[0].mxu1 }
  0xf7   : > { %v444_v20 = vpop.f32.mrb[1].mxu1 }
  0xfb   : > { %v747_v21 = vpop.f32.mrb[0].mxu0 }
  0xfc   : > { %v534_v22 = vadd.f32 %v747_v21, %v742_v19  ;;  %v528_v23 = vpop.f32.mrb[1].mxu0 }
  0xfd   : > { %v529_v24 = vadd.f32 %v528_v23, %v444_v20 }
  0xfe   : > { %538 = vst [vmem:[#allocation2 + $0x8] sm:$0xff] %v534_v22 }
  0xff   : > { %537 = vst [vmem:[#allocation2] sm:$0xff] %v529_v24 }
 0x106   : > { %v539_v28 = vld [vmem:[#allocation2] ss:$2 sm:$0xff]  ;;  %v541_v29 = vld [vmem:[#allocation2 + $0x1] ss:$2 sm:$0xff] }
 0x107   : > { %v551_v30 = vsel %vm550_vm7, %v539_v28, -inf  ;;  %v558_v31 = vsel %vm557_vm8, %v541_v29, -inf  ;;  %v560_v32 = vmax.f32 %v539_v28, %v541_v29 }
 0x108   : > { %v559_v33 = vmax.f32 %v551_v30, %v558_v31 }
 0x10a   : > { %v568_v35 = vsel %vm567_vm9, %v559_v33, %v560_v32 }
 0x10b   : > { %v576_v36 = vadd.f32 %v726_v34, %v568_v35 }
 0x10d   : > { %577 = vst [vmem:[%s316_s19] sm:$0xff] %v576_v36 }
 0x10e   : > { %837 = shalt.err (!%p834_p9)
}
 0x10f   : > { %s838_s3 = scalar_lea.hbm %s1063_s18, 128  ;;  %s842_s16 = scalar_lea.hbm %s1122_s6, 512 }
 0x110   : > { %p839_p10 = scmp.ne.s32.totalorder %s1063_s18, %s838_s3  ;;  %p843_p13 = scmp.lt.u32.totalorder %s1063_s18, %s1122_s6 }
 0x111   : > { %p844_p0 = scmp.lt.u32.totalorder %s842_s16, %s838_s3  ;;  %p846_p2 = scmp.lt.u32.totalorder %s838_s3, %s1063_s18 }
 0x112   : > { %p840_p11 = pnand %p839_p10, %p1008_p3 }
 0x113   : > { %p845_p1 = por %p844_p0, %p843_p13 }
 0x114   : > { %p841_p12 = pneg %p840_p11 }
 0x115   : > { %p847_p4 = por %p846_p2, %p845_p1 }
 0x117   : > { %p848_p5 = pnand %p847_p4, %p841_p12 }
 0x119   : > { %851 = shalt.err (!%p848_p5)
}
 0x11a   : > { %750 = dma.vmem_to_hbm [thread:$0]  (%p1008_p3), %s1065_s25, 128, %s1063_s18, %s579_s29  }
 0x11b PF: > { %p756_p6 = scmp.ge.s32.totalorder %s918_s28, 2  ;;  %s606_s24 = sand.u32 1, %s890_s21  }
 0x11c   : > { %s607_s20 = scalar_lea.sflag [#allocation4], %s606_s24 }
 0x11d   : > { %p753_p7 = pnand %p756_p6, %p1017_p8 }
 0x11f   : > { %885 = dma.done.wait (!%p753_p7), %s607_s20, 128  }
 0x120   : > { %887 = vsyncadd (!%p753_p7), %s607_s20, 4294967168  ;;  %s19_s28 = sadd.s32 1, %s918_s28   ;;  %s1129_s21 = smov %s894_s22 }
 0x121   : > { %p16_p9 = scmp.ge.s32.totalorder %s19_s28, 6   ;;  %s1130_s22 = smov %s898_s23 }
 0x122   : > { %s1131_s23 = smov %s1026_s15  ;;  %s1132_s24 = smov %s910_s26 }
 0x123   : > { %s1133_s25 = smov %s914_s27  ;;  %s1134_s26 = smov %s1137_s7 }
 0x124   : > { %s1135_s27 = smov %s1141_s8  ;;  %18 = sbr.rel (!%p16_p9) target bundleno = 8 (0x8), region = 87 }
 0x12b   :  { %612 = vsyncpa [#allocation4], 1 }
 0x12c   :  { %614 = vsyncpa [#allocation4 + $0x1], 1 }

</bundles_post_ra>
